<compile_context>
chip_gen: v7x
topology: tpu7x:2x2x1
jax: 0.10.0
libtpu: 0.0.40
codegen_flags: <defaults>
</compile_context>

<pallas_src>
import math
from functools import partial

import jax
import jax.numpy as jnp
from jax import lax
from jax.experimental import pallas as pl
from jax.experimental.pallas import tpu as pltpu

INPUT_NC = 16
NDF = 16
LN_EPS = 1e-5          # torch.nn.LayerNorm default
LANES = 128
TR_DEFAULT = 4096      # packed rows per grid step


# ---------------------------------------------------------------------------
# Kernel: fused (Linear -> LayerNorm -> ReLU) x 2 on one lane-packed row tile.
#   x_ref : (TR, G*c_in)   packed activations (G tokens per row)
#   w*_ref: (G*c, G*c)     block-diagonal weights
#   b*,g*,be*: (1, G*ndf)  tiled per-channel params
#   avg   : (G*ndf, G*ndf) block-diagonal 1/ndf averaging matrix (per-token LN)
# ---------------------------------------------------------------------------
def _fused_mlp2_kernel(x_ref,
                       w1_ref, b1_ref, g1_ref, be1_ref,
                       w2_ref, b2_ref, g2_ref, be2_ref,
                       avg_ref, o_ref):
    avg = avg_ref[...]

    def mlp(h, w_ref, b_ref, g_ref, be_ref):
        y = jnp.dot(h, w_ref[...], preferred_element_type=jnp.float32) + b_ref[...]
        # Per-token LayerNorm: mean/var over each token's ndf lanes via the
        # block-diagonal averaging matmul (keeps everything lane-dense on MXU).
        mu = jnp.dot(y, avg, preferred_element_type=jnp.float32)
        yc = y - mu
        var = jnp.dot(yc * yc, avg, preferred_element_type=jnp.float32)
        y = yc * lax.rsqrt(var + LN_EPS) * g_ref[...] + be_ref[...]
        return jnp.maximum(y, 0.0)

    y = mlp(x_ref[...], w1_ref, b1_ref, g1_ref, be1_ref)
    z = mlp(y, w2_ref, b2_ref, g2_ref, be2_ref)
    o_ref[...] = z.astype(o_ref.dtype)


# ---------------------------------------------------------------------------
# Wrapper
# ---------------------------------------------------------------------------
def _round_up(a, b):
    return (a + b - 1) // b * b


@partial(jax.jit, static_argnames=("tr",))
def projectors_linear_unet_forward(params, x, tr=TR_DEFAULT):
    """x: (..., input_nc) -> (..., ndf), fully fused Pallas forward."""
    *lead, c_in = x.shape
    ndf = params['w1'].shape[1]
    M = math.prod(lead) if lead else 1
    f32 = jnp.float32

    # Pack G tokens per 128-lane row when the feature dims allow it.
    if c_in == ndf and LANES % ndf == 0:
        groups = LANES // ndf
    else:
        groups = 1  # unpacked fallback (still correct, just not lane-dense)

    eye = jnp.eye(groups, dtype=f32)
    w1p = jnp.kron(eye, params['w1'].astype(f32))
    w2p = jnp.kron(eye, params['w2'].astype(f32))
    avg = jnp.kron(eye, jnp.full((ndf, ndf), 1.0 / ndf, dtype=f32))
    tile = lambda v: jnp.tile(v.astype(f32).reshape(1, -1), (1, groups))
    b1p, g1p, be1p = tile(params['b1']), tile(params['g1']), tile(params['be1'])
    b2p, g2p, be2p = tile(params['b2']), tile(params['g2']), tile(params['be2'])

    fin = groups * c_in
    fout = groups * ndf

    # Row tiling of the packed array (free row-major reshape of (M, c_in)).
    R = -(-M // groups)                    # packed rows needed
    tr = min(tr, _round_up(R, 8))
    Rp = _round_up(R, tr)
    Mp = Rp * groups

    x2 = x.reshape(M, c_in).astype(f32)
    if Mp != M:
        x2 = jnp.pad(x2, ((0, Mp - M), (0, 0)))
    xp = x2.reshape(Rp, fin)

    rows = lambda i: (i, 0)   # row-tiled activation blocks
    full = lambda i: (0, 0)   # weight / per-channel param blocks (reused)

    out = pl.pallas_call(
        _fused_mlp2_kernel,
        out_shape=jax.ShapeDtypeStruct((Rp, fout), f32),
        grid=(Rp // tr,),
        in_specs=[
            pl.BlockSpec((tr, fin), rows),      # packed x tile
            pl.BlockSpec((fin, fout), full),    # W1 (block-diag)
            pl.BlockSpec((1, fout), full),      # b1
            pl.BlockSpec((1, fout), full),      # gamma1
            pl.BlockSpec((1, fout), full),      # beta1
            pl.BlockSpec((fout, fout), full),   # W2 (block-diag)
            pl.BlockSpec((1, fout), full),      # b2
            pl.BlockSpec((1, fout), full),      # gamma2
            pl.BlockSpec((1, fout), full),      # beta2
            pl.BlockSpec((fout, fout), full),   # LN averaging matrix
        ],
        out_specs=pl.BlockSpec((tr, fout), rows),
        compiler_params=pltpu.CompilerParams(
            dimension_semantics=("parallel",)),
    )(xp, w1p, b1p, g1p, be1p, w2p, b2p, g2p, be2p, avg)

    return out.reshape(Mp, ndf)[:M].reshape(*lead, ndf)


# ---------------------------------------------------------------------------
# Parameters + pure-JAX reference (for correctness check)
# ---------------------------------------------------------------------------
def init_params(key, input_nc=INPUT_NC, ndf=NDF):
    ks = jax.random.split(key, 8)
    w1 = jax.random.normal(ks[0], (input_nc, ndf), jnp.float32) / math.sqrt(input_nc)
    b1 = jax.random.normal(ks[1], (1, ndf), jnp.float32) * 0.05
    g1 = 1.0 + 0.1 * jax.random.normal(ks[2], (1, ndf), jnp.float32)
    be1 = 0.05 * jax.random.normal(ks[3], (1, ndf), jnp.float32)
    w2 = jax.random.normal(ks[4], (ndf, ndf), jnp.float32) / math.sqrt(ndf)
    b2 = jax.random.normal(ks[5], (1, ndf), jnp.float32) * 0.05
    g2 = 1.0 + 0.1 * jax.random.normal(ks[6], (1, ndf), jnp.float32)
    be2 = 0.05 * jax.random.normal(ks[7], (1, ndf), jnp.float32)
    return dict(w1=w1, b1=b1, g1=g1, be1=be1,
                w2=w2, b2=b2, g2=g2, be2=be2)


def reference_forward(params, x):
    def mlp(h, w, b, g, be):
        y = h @ w + b
        mu = y.mean(-1, keepdims=True)
        var = ((y - mu) ** 2).mean(-1, keepdims=True)
        y = (y - mu) / jnp.sqrt(var + LN_EPS) * g + be
        return jnp.maximum(y, 0.0)
    y = mlp(x.astype(jnp.float32), params['w1'], params['b1'], params['g1'], params['be1'])
    return mlp(y, params['w2'], params['b2'], params['g2'], params['be2'])


if __name__ == "__main__":
    key = jax.random.PRNGKey(0)
    k_par, k_a, k_b = jax.random.split(key, 3)

    params = init_params(k_par)

    # Small case: batch=2, seq=8, input_nc=16 (single grid step, padding path).
    x_small = jax.random.normal(k_a, (2, 8, INPUT_NC), jnp.float32)
    out_small = jax.block_until_ready(projectors_linear_unet_forward(params, x_small))
    ref_small = reference_forward(params, x_small)
    assert out_small.shape == (2, 8, NDF), out_small.shape
    assert out_small.dtype == jnp.float32
    assert jnp.max(jnp.abs(out_small - ref_small)) < 1e-4

    # Larger case: forces multiple grid steps (tr=32 packed rows) + padding.
    x_big = jax.random.normal(k_b, (4, 200, INPUT_NC), jnp.float32)
    out_big = jax.block_until_ready(projectors_linear_unet_forward(params, x_big, tr=32))
    ref_big = reference_forward(params, x_big)
    assert out_big.shape == (4, 200, NDF), out_big.shape
    assert jnp.max(jnp.abs(out_big - ref_big)) < 1e-4

    print("KERNEL_OK")
</pallas_src>

<mosaic_0001>
module attributes {stable_mosaic.version = 11 : i64} {
  func.func @_fused_mlp2_kernel(%arg0: i32, %arg1: memref<8x128xf32, #tpu.memory_space<vmem>>, %arg2: memref<128x128xf32, #tpu.memory_space<vmem>>, %arg3: memref<1x128xf32, #tpu.memory_space<vmem>>, %arg4: memref<1x128xf32, #tpu.memory_space<vmem>>, %arg5: memref<1x128xf32, #tpu.memory_space<vmem>>, %arg6: memref<128x128xf32, #tpu.memory_space<vmem>>, %arg7: memref<1x128xf32, #tpu.memory_space<vmem>>, %arg8: memref<1x128xf32, #tpu.memory_space<vmem>>, %arg9: memref<1x128xf32, #tpu.memory_space<vmem>>, %arg10: memref<128x128xf32, #tpu.memory_space<vmem>>, %arg11: memref<8x128xf32, #tpu.memory_space<vmem>>) attributes {dimension_semantics = [#tpu.dimension_semantics<parallel>], iteration_bounds = array<i64: 1>, scalar_prefetch = 0 : i64, scratch_operands = 0 : i64, tpu.core_type = #tpu.core_type<tc>, window_params = [{transform_indices = @transform_0, window_bounds = array<i64: 8, 128>}, {pipeline_mode = #tpu.pipeline_mode<synchronous>, transform_indices = @transform_1, window_bounds = array<i64: 128, 128>}, {pipeline_mode = #tpu.pipeline_mode<synchronous>, transform_indices = @transform_2, window_bounds = array<i64: 1, 128>}, {pipeline_mode = #tpu.pipeline_mode<synchronous>, transform_indices = @transform_3, window_bounds = array<i64: 1, 128>}, {pipeline_mode = #tpu.pipeline_mode<synchronous>, transform_indices = @transform_4, window_bounds = array<i64: 1, 128>}, {pipeline_mode = #tpu.pipeline_mode<synchronous>, transform_indices = @transform_5, window_bounds = array<i64: 128, 128>}, {pipeline_mode = #tpu.pipeline_mode<synchronous>, transform_indices = @transform_6, window_bounds = array<i64: 1, 128>}, {pipeline_mode = #tpu.pipeline_mode<synchronous>, transform_indices = @transform_7, window_bounds = array<i64: 1, 128>}, {pipeline_mode = #tpu.pipeline_mode<synchronous>, transform_indices = @transform_8, window_bounds = array<i64: 1, 128>}, {pipeline_mode = #tpu.pipeline_mode<synchronous>, transform_indices = @transform_9, window_bounds = array<i64: 128, 128>}, {transform_indices = @transform_10, window_bounds = array<i64: 8, 128>}]} {
    %c0 = arith.constant 0 : index
    %c0_0 = arith.constant 0 : index
    %0 = vector.load %arg10[%c0, %c0_0] : memref<128x128xf32, #tpu.memory_space<vmem>>, vector<128x128xf32>
    %c0_1 = arith.constant 0 : index
    %c0_2 = arith.constant 0 : index
    %1 = vector.load %arg1[%c0_1, %c0_2] : memref<8x128xf32, #tpu.memory_space<vmem>>, vector<8x128xf32>
    %c0_3 = arith.constant 0 : index
    %c0_4 = arith.constant 0 : index
    %2 = vector.load %arg2[%c0_3, %c0_4] : memref<128x128xf32, #tpu.memory_space<vmem>>, vector<128x128xf32>
    %cst = arith.constant dense<0.000000e+00> : vector<8x128xf32>
    %3 = tpu.matmul %1, %2, %cst {dimension_numbers = #tpu.dot_dimension_numbers<[1], [0], [0], [1], [0, 0, 1, 1], [], []>} : vector<8x128xf32>, vector<128x128xf32>, vector<8x128xf32> -> vector<8x128xf32>
    %c0_5 = arith.constant 0 : index
    %c0_6 = arith.constant 0 : index
    %4 = vector.load %arg3[%c0_5, %c0_6] : memref<1x128xf32, #tpu.memory_space<vmem>>, vector<1x128xf32>
    %5 = vector.broadcast %4 : vector<1x128xf32> to vector<8x128xf32>
    %6 = arith.addf %3, %5 : vector<8x128xf32>
    %cst_7 = arith.constant dense<0.000000e+00> : vector<8x128xf32>
    %7 = tpu.matmul %6, %0, %cst_7 {dimension_numbers = #tpu.dot_dimension_numbers<[1], [0], [0], [1], [0, 0, 1, 1], [], []>} : vector<8x128xf32>, vector<128x128xf32>, vector<8x128xf32> -> vector<8x128xf32>
    %8 = arith.subf %6, %7 : vector<8x128xf32>
    %9 = arith.mulf %8, %8 : vector<8x128xf32>
    %cst_8 = arith.constant dense<0.000000e+00> : vector<8x128xf32>
    %10 = tpu.matmul %9, %0, %cst_8 {dimension_numbers = #tpu.dot_dimension_numbers<[1], [0], [0], [1], [0, 0, 1, 1], [], []>} : vector<8x128xf32>, vector<128x128xf32>, vector<8x128xf32> -> vector<8x128xf32>
    %cst_9 = arith.constant 9.99999974E-6 : f32
    %11 = vector.broadcast %cst_9 : f32 to vector<8x128xf32>
    %12 = arith.addf %10, %11 : vector<8x128xf32>
    %13 = math.rsqrt %12 : vector<8x128xf32>
    %14 = arith.mulf %8, %13 : vector<8x128xf32>
    %c0_10 = arith.constant 0 : index
    %c0_11 = arith.constant 0 : index
    %15 = vector.load %arg4[%c0_10, %c0_11] : memref<1x128xf32, #tpu.memory_space<vmem>>, vector<1x128xf32>
    %16 = vector.broadcast %15 : vector<1x128xf32> to vector<8x128xf32>
    %17 = arith.mulf %14, %16 : vector<8x128xf32>
    %c0_12 = arith.constant 0 : index
    %c0_13 = arith.constant 0 : index
    %18 = vector.load %arg5[%c0_12, %c0_13] : memref<1x128xf32, #tpu.memory_space<vmem>>, vector<1x128xf32>
    %19 = vector.broadcast %18 : vector<1x128xf32> to vector<8x128xf32>
    %20 = arith.addf %17, %19 : vector<8x128xf32>
    %cst_14 = arith.constant 0.000000e+00 : f32
    %21 = vector.broadcast %cst_14 : f32 to vector<8x128xf32>
    %22 = arith.maximumf %20, %21 : vector<8x128xf32>
    %c0_15 = arith.constant 0 : index
    %c0_16 = arith.constant 0 : index
    %23 = vector.load %arg6[%c0_15, %c0_16] : memref<128x128xf32, #tpu.memory_space<vmem>>, vector<128x128xf32>
    %cst_17 = arith.constant dense<0.000000e+00> : vector<8x128xf32>
    %24 = tpu.matmul %22, %23, %cst_17 {dimension_numbers = #tpu.dot_dimension_numbers<[1], [0], [0], [1], [0, 0, 1, 1], [], []>} : vector<8x128xf32>, vector<128x128xf32>, vector<8x128xf32> -> vector<8x128xf32>
    %c0_18 = arith.constant 0 : index
    %c0_19 = arith.constant 0 : index
    %25 = vector.load %arg7[%c0_18, %c0_19] : memref<1x128xf32, #tpu.memory_space<vmem>>, vector<1x128xf32>
    %26 = vector.broadcast %25 : vector<1x128xf32> to vector<8x128xf32>
    %27 = arith.addf %24, %26 : vector<8x128xf32>
    %cst_20 = arith.constant dense<0.000000e+00> : vector<8x128xf32>
    %28 = tpu.matmul %27, %0, %cst_20 {dimension_numbers = #tpu.dot_dimension_numbers<[1], [0], [0], [1], [0, 0, 1, 1], [], []>} : vector<8x128xf32>, vector<128x128xf32>, vector<8x128xf32> -> vector<8x128xf32>
    %29 = arith.subf %27, %28 : vector<8x128xf32>
    %30 = arith.mulf %29, %29 : vector<8x128xf32>
    %cst_21 = arith.constant dense<0.000000e+00> : vector<8x128xf32>
    %31 = tpu.matmul %30, %0, %cst_21 {dimension_numbers = #tpu.dot_dimension_numbers<[1], [0], [0], [1], [0, 0, 1, 1], [], []>} : vector<8x128xf32>, vector<128x128xf32>, vector<8x128xf32> -> vector<8x128xf32>
    %cst_22 = arith.constant 9.99999974E-6 : f32
    %32 = vector.broadcast %cst_22 : f32 to vector<8x128xf32>
    %33 = arith.addf %31, %32 : vector<8x128xf32>
    %34 = math.rsqrt %33 : vector<8x128xf32>
    %35 = arith.mulf %29, %34 : vector<8x128xf32>
    %c0_23 = arith.constant 0 : index
    %c0_24 = arith.constant 0 : index
    %36 = vector.load %arg8[%c0_23, %c0_24] : memref<1x128xf32, #tpu.memory_space<vmem>>, vector<1x128xf32>
    %37 = vector.broadcast %36 : vector<1x128xf32> to vector<8x128xf32>
    %38 = arith.mulf %35, %37 : vector<8x128xf32>
    %c0_25 = arith.constant 0 : index
    %c0_26 = arith.constant 0 : index
    %39 = vector.load %arg9[%c0_25, %c0_26] : memref<1x128xf32, #tpu.memory_space<vmem>>, vector<1x128xf32>
    %40 = vector.broadcast %39 : vector<1x128xf32> to vector<8x128xf32>
    %41 = arith.addf %38, %40 : vector<8x128xf32>
    %cst_27 = arith.constant 0.000000e+00 : f32
    %42 = vector.broadcast %cst_27 : f32 to vector<8x128xf32>
    %43 = arith.maximumf %41, %42 : vector<8x128xf32>
    %c0_28 = arith.constant 0 : index
    %c0_29 = arith.constant 0 : index
    %44 = vector.load %arg11[%c0_28, %c0_29] : memref<8x128xf32, #tpu.memory_space<vmem>>, vector<8x128xf32>
    tpu.vector_store %arg11[%c0_28, %c0_29], %43 {strides = array<i32>} : memref<8x128xf32, #tpu.memory_space<vmem>>, vector<8x128xf32>,
    return
  }
  func.func @transform_0(%arg0: i32) -> (i32, i32) {
    %c0_i32 = arith.constant 0 : i32
    %c0_i32_0 = arith.constant 0 : i32
    return %arg0, %c0_i32 : i32, i32
  }
  func.func @transform_1(%arg0: i32) -> (i32, i32) {
    %c0_i32 = arith.constant 0 : i32
    %c0_i32_0 = arith.constant 0 : i32
    %c0_i32_1 = arith.constant 0 : i32
    return %c0_i32, %c0_i32_0 : i32, i32
  }
  func.func @transform_2(%arg0: i32) -> (i32, i32) {
    %c0_i32 = arith.constant 0 : i32
    %c0_i32_0 = arith.constant 0 : i32
    %c0_i32_1 = arith.constant 0 : i32
    return %c0_i32, %c0_i32_0 : i32, i32
  }
  func.func @transform_3(%arg0: i32) -> (i32, i32) {
    %c0_i32 = arith.constant 0 : i32
    %c0_i32_0 = arith.constant 0 : i32
    %c0_i32_1 = arith.constant 0 : i32
    return %c0_i32, %c0_i32_0 : i32, i32
  }
  func.func @transform_4(%arg0: i32) -> (i32, i32) {
    %c0_i32 = arith.constant 0 : i32
    %c0_i32_0 = arith.constant 0 : i32
    %c0_i32_1 = arith.constant 0 : i32
    return %c0_i32, %c0_i32_0 : i32, i32
  }
  func.func @transform_5(%arg0: i32) -> (i32, i32) {
    %c0_i32 = arith.constant 0 : i32
    %c0_i32_0 = arith.constant 0 : i32
    %c0_i32_1 = arith.constant 0 : i32
    return %c0_i32, %c0_i32_0 : i32, i32
  }
  func.func @transform_6(%arg0: i32) -> (i32, i32) {
    %c0_i32 = arith.constant 0 : i32
    %c0_i32_0 = arith.constant 0 : i32
    %c0_i32_1 = arith.constant 0 : i32
    return %c0_i32, %c0_i32_0 : i32, i32
  }
  func.func @transform_7(%arg0: i32) -> (i32, i32) {
    %c0_i32 = arith.constant 0 : i32
    %c0_i32_0 = arith.constant 0 : i32
    %c0_i32_1 = arith.constant 0 : i32
    return %c0_i32, %c0_i32_0 : i32, i32
  }
  func.func @transform_8(%arg0: i32) -> (i32, i32) {
    %c0_i32 = arith.constant 0 : i32
    %c0_i32_0 = arith.constant 0 : i32
    %c0_i32_1 = arith.constant 0 : i32
    return %c0_i32, %c0_i32_0 : i32, i32
  }
  func.func @transform_9(%arg0: i32) -> (i32, i32) {
    %c0_i32 = arith.constant 0 : i32
    %c0_i32_0 = arith.constant 0 : i32
    %c0_i32_1 = arith.constant 0 : i32
    return %c0_i32, %c0_i32_0 : i32, i32
  }
  func.func @transform_10(%arg0: i32) -> (i32, i32) {
    %c0_i32 = arith.constant 0 : i32
    %c0_i32_0 = arith.constant 0 : i32
    return %arg0, %c0_i32 : i32, i32
  }
}

</mosaic_0001>

<bundles_post_ra>
// kernel: projectors_linear_unet_forward.1
= control target key start
LH: loop header
LB: loop body
LE: loop exit
PB: predicated region body
PF: predicated region fallthrough
CT: control target
= control target key end

     0   :  { %v1034_v0 = vmov 0.0|0.0   ;;  %vm1035_vm0 = vmmov 0   ;;  %v1036_v4 = vmov 0.0   ;;  %s1368_s1 = inlined_call_operand.vmem [shape: f32[128,128], index: 1, kind: input, shape index: {}]   ;;  %s1369_s9 = inlined_call_operand.vmem [shape: f32[128,128], index: 9, kind: input, shape index: {}]   ;;  %s1370_s0 = inlined_call_operand.vmem [shape: f32[8,128], index: 0, kind: input, shape index: {}]   ;;  %s1371_s2 = inlined_call_operand.vmem [shape: f32[1,128], index: 2, kind: input, shape index: {}]   ;;  %s1372_s5 = inlined_call_operand.vmem [shape: f32[128,128], index: 5, kind: input, shape index: {}]   ;;  %s1373_s3 = inlined_call_operand.vmem [shape: f32[1,128], index: 3, kind: input, shape index: {}]   ;;  %s1374_s4 = inlined_call_operand.vmem [shape: f32[1,128], index: 4, kind: input, shape index: {}]   ;;  %s1375_s6 = inlined_call_operand.vmem [shape: f32[1,128], index: 6, kind: input, shape index: {}]   ;;  %s1376_s7 = inlined_call_operand.vmem [shape: f32[1,128], index: 7, kind: input, shape index: {}]   ;;  %s1377_s8 = inlined_call_operand.vmem [shape: f32[1,128], index: 8, kind: input, shape index: {}]   ;;  %s1378_s10 = inlined_call_operand.vmem [shape: f32[8,128], index: 10, kind: output, shape index: {}]  }
   0x1   :  { %883 = vmatprep.subr.bf16.mxu0 %v1034_v0  ;;  %v52_v1 = vld [vmem:[%s1368_s1] sm:$0xff]  ;;  %v53_v2 = vld [vmem:[%s1368_s1 + $0x8] sm:$0xff]  ;;  %v54_v3 = vld [vmem:[%s1368_s1 + $0x10] sm:$0xff]  ;;  %705 = vmatprep.mubr.msk.f32.mxu0 %vm1035_vm0, %v1036_v4 }
   0x2   :  { %v884_v5 = vpack.c.bf16 %v53_v2, %v52_v1  ;;  %v55_v6 = vld [vmem:[%s1368_s1 + $0x18] sm:$0xff]  ;;  %907 = vmatprep.subr.bf16.mxu1 %v1034_v0  ;;  %740 = vmatprep.mubr.msk.f32.mxu1 %vm1035_vm0, %v1036_v4  ;;  %v56_v8 = vld [vmem:[%s1368_s1 + $0x20] sm:$0xff]  ;;  %v57_v9 = vld [vmem:[%s1368_s1 + $0x28] sm:$0xff] }
   0x3   :  { %v887_v7 = vpack.c.bf16 %v55_v6, %v54_v3  ;;  %v35_v10 = vld [vmem:[%s1369_s9] sm:$0xff]  ;;  %v36_v11 = vld [vmem:[%s1369_s9 + $0x8] sm:$0xff]  ;;  %v37_v12 = vld [vmem:[%s1369_s9 + $0x10] sm:$0xff]  ;;  %v890_v14 = vpack.c.bf16 %v57_v9, %v56_v8 }
   0x4   :  { %885 = vmatpush3.bf16.msra.mxu0 %v884_v5  ;;  %v38_v13 = vld [vmem:[%s1369_s9 + $0x18] sm:$0xff]  ;;  %v1129_v15 = vpack.c.bf16 %v36_v11, %v35_v10  ;;  %v58_v16 = vld [vmem:[%s1368_s1 + $0x30] sm:$0xff]  ;;  %v39_v19 = vld [vmem:[%s1369_s9 + $0x20] sm:$0xff] }
   0x5   :  { %886 = vmatprep.subr.bf16.mxu0 %v1034_v0  ;;  %v59_v17 = vld [vmem:[%s1368_s1 + $0x38] sm:$0xff]  ;;  %v1139_v18 = vpack.c.bf16 %v38_v13, %v37_v12  ;;  %v40_v20 = vld [vmem:[%s1369_s9 + $0x28] sm:$0xff]  ;;  %v60_v22 = vld [vmem:[%s1368_s1 + $0x40] sm:$0xff] }
   0x6   :  { %909 = vmatpush3.bf16.msra.mxu1 %v1129_v15  ;;  %v893_v21 = vpack.c.bf16 %v59_v17, %v58_v16  ;;  %v61_v23 = vld [vmem:[%s1368_s1 + $0x48] sm:$0xff]  ;;  %v1156_v24 = vpack.c.bf16 %v40_v20, %v39_v19  ;;  %v41_v25 = vld [vmem:[%s1369_s9 + $0x30] sm:$0xff]  ;;  %v42_v26 = vld [vmem:[%s1369_s9 + $0x38] sm:$0xff] }
   0x7   :  { %910 = vmatprep.subr.bf16.mxu1 %v1034_v0  ;;  %v896_v27 = vpack.c.bf16 %v61_v23, %v60_v22  ;;  %v62_v28 = vld [vmem:[%s1368_s1 + $0x50] sm:$0xff]  ;;  %v63_v29 = vld [vmem:[%s1368_s1 + $0x58] sm:$0xff]  ;;  %v1173_v30 = vpack.c.bf16 %v42_v26, %v41_v25  ;;  %v43_v31 = vld [vmem:[%s1369_s9 + $0x40] sm:$0xff] }
   0x8   :  { %888 = vmatpush3.bf16.msra.mxu0 %v887_v7  ;;  %v44_v32 = vld [vmem:[%s1369_s9 + $0x48] sm:$0xff]  ;;  %v899_v33 = vpack.c.bf16 %v63_v29, %v62_v28  ;;  %v64_v34 = vld [vmem:[%s1368_s1 + $0x60] sm:$0xff]  ;;  %v45_v37 = vld [vmem:[%s1369_s9 + $0x50] sm:$0xff] }
   0x9   :  { %889 = vmatprep.subr.bf16.mxu0 %v1034_v0  ;;  %v65_v35 = vld [vmem:[%s1368_s1 + $0x68] sm:$0xff]  ;;  %v1190_v36 = vpack.c.bf16 %v44_v32, %v43_v31  ;;  %v46_v38 = vld [vmem:[%s1369_s9 + $0x58] sm:$0xff]  ;;  %v66_v40 = vld [vmem:[%s1368_s1 + $0x70] sm:$0xff] }
   0xa   :  { %912 = vmatpush3.bf16.msra.mxu1 %v1139_v18  ;;  %v902_v39 = vpack.c.bf16 %v65_v35, %v64_v34  ;;  %v67_v41 = vld [vmem:[%s1368_s1 + $0x78] sm:$0xff]  ;;  %v1207_v42 = vpack.c.bf16 %v46_v38, %v45_v37  ;;  %v47_v43 = vld [vmem:[%s1369_s9 + $0x60] sm:$0xff]  ;;  %v48_v44 = vld [vmem:[%s1369_s9 + $0x68] sm:$0xff] }
   0xb   :  { %913 = vmatprep.subr.bf16.mxu1 %v1034_v0  ;;  %v905_v45 = vpack.c.bf16 %v67_v41, %v66_v40  ;;  %v1218_v46 = vpack.c.bf16 %v48_v44, %v47_v43  ;;  %v51_v47 = vld [vmem:[%s1370_s0] sm:$0xff]  ;;  %v49_v48 = vld [vmem:[%s1369_s9 + $0x70] sm:$0xff]  ;;  %v50_v49 = vld [vmem:[%s1369_s9 + $0x78] sm:$0xff] }
   0xc   :  { %891 = vmatpush3.bf16.msra.mxu0 %v890_v14  ;;  %v1249_v50 = vpack.c.bf16 %v50_v49, %v49_v48  ;;  %v565_v51 = vld [vmem:[%s1371_s2] ss:$0 sm:$0xff]  ;;  %v307_v56 = vld [vmem:[%s1372_s5 + $0x8] sm:$0xff]  ;;  %v308_v57 = vld [vmem:[%s1372_s5 + $0x10] sm:$0xff] }
   0xd   :  { %892 = vmatprep.subr.bf16.mxu0 %v1034_v0  ;;  %v306_v55 = vld [vmem:[%s1372_s5] sm:$0xff]  ;;  %v309_v59 = vld [vmem:[%s1372_s5 + $0x18] sm:$0xff]  ;;  %v311_v62 = vld [vmem:[%s1372_s5 + $0x28] sm:$0xff] }
   0xe   :  { %915 = vmatpush3.bf16.msra.mxu1 %v1156_v24  ;;  %v956_v58 = vpack.c.bf16 %v307_v56, %v306_v55  ;;  %v959_v60 = vpack.c.bf16 %v309_v59, %v308_v57  ;;  %v310_v61 = vld [vmem:[%s1372_s5 + $0x20] sm:$0xff]  ;;  %v312_v6 = vld [vmem:[%s1372_s5 + $0x30] sm:$0xff]  ;;  %v313_v7 = vld [vmem:[%s1372_s5 + $0x38] sm:$0xff] }
   0xf   :  { %916 = vmatprep.subr.bf16.mxu1 %v1034_v0  ;;  %v962_v63 = vpack.c.bf16 %v311_v62, %v310_v61  ;;  %v965_v8 = vpack.c.bf16 %v313_v7, %v312_v6  ;;  %v314_v9 = vld [vmem:[%s1372_s5 + $0x40] sm:$0xff]  ;;  %v315_v10 = vld [vmem:[%s1372_s5 + $0x48] sm:$0xff]  ;;  %v316_v12 = vld [vmem:[%s1372_s5 + $0x50] sm:$0xff] }
  0x10   :  { %894 = vmatpush3.bf16.msra.mxu0 %v893_v21  ;;  %v968_v11 = vpack.c.bf16 %v315_v10, %v314_v9  ;;  %v317_v13 = vld [vmem:[%s1372_s5 + $0x58] sm:$0xff]  ;;  %v318_v16 = vld [vmem:[%s1372_s5 + $0x60] sm:$0xff]  ;;  %v319_v17 = vld [vmem:[%s1372_s5 + $0x68] sm:$0xff] }
  0x11   :  { %895 = vmatprep.subr.bf16.mxu0 %v1034_v0  ;;  %v971_v14 = vpack.c.bf16 %v317_v13, %v316_v12  ;;  %v974_v19 = vpack.c.bf16 %v319_v17, %v318_v16  ;;  %v320_v20 = vld [vmem:[%s1372_s5 + $0x70] sm:$0xff]  ;;  %v321_v21 = vld [vmem:[%s1372_s5 + $0x78] sm:$0xff]  ;;  %v566_v28 = vld [vmem:[%s1373_s3] ss:$0 sm:$0xff] }
  0x12   :  { %918 = vmatpush3.bf16.msra.mxu1 %v1173_v30  ;;  %v977_v22 = vpack.c.bf16 %v321_v21, %v320_v20  ;;  %v567_v31 = vld [vmem:[%s1374_s4] ss:$0 sm:$0xff] }
  0x13   :  { %919 = vmatprep.subr.bf16.mxu1 %v1034_v0  ;;  %v569_v41 = vld [vmem:[%s1376_s7] ss:$0 sm:$0xff] }
  0x14   :  { %897 = vmatpush3.bf16.msra.mxu0 %v896_v27  ;;  %v570_v43 = vld [vmem:[%s1377_s8] ss:$0 sm:$0xff] }
  0x15   :  { %898 = vmatprep.subr.bf16.mxu0 %v1034_v0 }
  0x16   :  { %921 = vmatpush3.bf16.msra.mxu1 %v1190_v36 }
  0x17   :  { %922 = vmatprep.subr.bf16.mxu1 %v1034_v0 }
  0x18   :  { %900 = vmatpush3.bf16.msra.mxu0 %v899_v33 }
  0x19   :  { %901 = vmatprep.subr.bf16.mxu0 %v1034_v0 }
  0x1a   :  { %924 = vmatpush3.bf16.msra.mxu1 %v1207_v42 }
  0x1b   :  { %925 = vmatprep.subr.bf16.mxu1 %v1034_v0 }
  0x1c   :  { %903 = vmatpush3.bf16.msra.mxu0 %v902_v39 }
  0x1d   :  { %904 = vmatprep.subr.bf16.mxu0 %v1034_v0 }
  0x1e   :  { %927 = vmatpush3.bf16.msra.mxu1 %v1218_v46 }
  0x1f   :  { %928 = vmatprep.subr.bf16.mxu1 %v1034_v0 }
  0x20   :  { %906 = vmatpush3.bf16.msra.mxu0 %v905_v45 }
  0x21   :  { %931 = vmatprep.subr.bf16.mxu0 %v1034_v0 }
  0x22   :  { %930 = vmatpush3.bf16.msra.mxu1 %v1249_v50 }
  0x23   :  { %706 = vmatmul.mubr.f32.vlgmr.msra.gmra.mrb[0].mxu0 %v51_v47  ;;  %955 = vmatprep.subr.bf16.mxu1 %v1034_v0 }
  0x24   :  { %933 = vmatpush3.bf16.msra.mxu0 %v1129_v15  ;;  %775 = vmatprep.mubr.msk.f32.mxu0 %vm1035_vm0, %v1036_v4 }
  0x25   :  { %934 = vmatprep.subr.bf16.mxu0 %v1034_v0 }
  0x28   :  { %936 = vmatpush3.bf16.msra.mxu0 %v1139_v18 }
  0x29   :  { %937 = vmatprep.subr.bf16.mxu0 %v1034_v0 }
  0x2c   :  { %939 = vmatpush3.bf16.msra.mxu0 %v1156_v24 }
  0x2d   :  { %940 = vmatprep.subr.bf16.mxu0 %v1034_v0 }
  0x30   :  { %942 = vmatpush3.bf16.msra.mxu0 %v1173_v30 }
  0x31   :  { %943 = vmatprep.subr.bf16.mxu0 %v1034_v0 }
  0x34   :  { %945 = vmatpush3.bf16.msra.mxu0 %v1190_v36 }
  0x35   :  { %946 = vmatprep.subr.bf16.mxu0 %v1034_v0 }
  0x38   :  { %948 = vmatpush3.bf16.msra.mxu0 %v1207_v42 }
  0x39   :  { %949 = vmatprep.subr.bf16.mxu0 %v1034_v0 }
  0x3c   :  { %951 = vmatpush3.bf16.msra.mxu0 %v1218_v46 }
  0x3d   :  { %952 = vmatprep.subr.bf16.mxu0 %v1034_v0 }
  0x40   :  { %954 = vmatpush3.bf16.msra.mxu0 %v1249_v50 }
  0x41   :  { %979 = vmatprep.subr.bf16.mxu0 %v1034_v0 }
  0xf6   :  { %v141_v52 = vpop.f32.mrb[0].mxu0 }
  0xf7   :  { %v142_v53 = vadd.f32 %v565_v51, %v141_v52  ;;  %v707_v54 = vpop.f32.mrb[1].mxu0 }
  0xf9   :  { %741 = vmatmul.mubr.f32.vlgmr.msra.gmra.mrb[0].mxu1 %v142_v53 }
  0xfa   :  { %810 = vmatprep.mubr.msk.f32.mxu1 %vm1035_vm0, %v1036_v4  ;;  %957 = vmatpush3.bf16.msra.mxu1 %v956_v58 }
  0xfb   :  { %958 = vmatprep.subr.bf16.mxu1 %v1034_v0 }
  0xfe   :  { %960 = vmatpush3.bf16.msra.mxu1 %v959_v60 }
  0xff   :  { %961 = vmatprep.subr.bf16.mxu1 %v1034_v0 }
 0x102   :  { %963 = vmatpush3.bf16.msra.mxu1 %v962_v63 }
 0x103   :  { %964 = vmatprep.subr.bf16.mxu1 %v1034_v0 }
 0x106   :  { %966 = vmatpush3.bf16.msra.mxu1 %v965_v8 }
 0x107   :  { %967 = vmatprep.subr.bf16.mxu1 %v1034_v0 }
 0x10a   :  { %969 = vmatpush3.bf16.msra.mxu1 %v968_v11 }
 0x10b   :  { %970 = vmatprep.subr.bf16.mxu1 %v1034_v0 }
 0x10e   :  { %972 = vmatpush3.bf16.msra.mxu1 %v971_v14 }
 0x10f   :  { %973 = vmatprep.subr.bf16.mxu1 %v1034_v0 }
 0x112   :  { %975 = vmatpush3.bf16.msra.mxu1 %v974_v19 }
 0x113   :  { %976 = vmatprep.subr.bf16.mxu1 %v1034_v0 }
 0x116   :  { %978 = vmatpush3.bf16.msra.mxu1 %v977_v22 }
 0x117   :  { %1003 = vmatprep.subr.bf16.mxu1 %v1034_v0 }
 0x1cc   :  { %v211_v1 = vpop.f32.mrb[0].mxu1 }
 0x1cd   :  { %v215_v2 = vsub.f32 %v142_v53, %v211_v1  ;;  %v742_v3 = vpop.f32.mrb[1].mxu1 }
 0x1cf   :  { %v216_v5 = vmul.f32 %v215_v2, %v215_v2 }
 0x1d1   :  { %776 = vmatmul.mubr.f32.vlgmr.msra.gmra.mrb[2].mxu0 %v216_v5 }
 0x1d2   :  { %981 = vmatpush3.bf16.msra.mxu0 %v1129_v15  ;;  %845 = vmatprep.mubr.msk.f32.mxu0 %vm1035_vm0, %v1036_v4 }
 0x1d3   :  { %982 = vmatprep.subr.bf16.mxu0 %v1034_v0 }
 0x1d6   :  { %984 = vmatpush3.bf16.msra.mxu0 %v1139_v18 }
 0x1d7   :  { %985 = vmatprep.subr.bf16.mxu0 %v1034_v0 }
 0x1da   :  { %987 = vmatpush3.bf16.msra.mxu0 %v1156_v24 }
 0x1db   :  { %988 = vmatprep.subr.bf16.mxu0 %v1034_v0 }
 0x1de   :  { %990 = vmatpush3.bf16.msra.mxu0 %v1173_v30 }
 0x1df   :  { %991 = vmatprep.subr.bf16.mxu0 %v1034_v0 }
 0x1e2   :  { %993 = vmatpush3.bf16.msra.mxu0 %v1190_v36 }
 0x1e3   :  { %994 = vmatprep.subr.bf16.mxu0 %v1034_v0 }
 0x1e6   :  { %996 = vmatpush3.bf16.msra.mxu0 %v1207_v42 }
 0x1e7   :  { %997 = vmatprep.subr.bf16.mxu0 %v1034_v0 }
 0x1ea   :  { %999 = vmatpush3.bf16.msra.mxu0 %v1218_v46 }
 0x1eb   :  { %1000 = vmatprep.subr.bf16.mxu0 %v1034_v0 }
 0x1ee   :  { %1002 = vmatpush3.bf16.msra.mxu0 %v1249_v50 }
 0x2a4   :  { %v283_v23 = vpop.f32.mrb[2].mxu0 }
 0x2a5   :  { %v284_v25 = vadd.f32 1e-05, %v283_v23  ;;  %v777_v26 = vpop.f32.mrb[3].mxu0 }
 0x2a7   :  { %1030 = vrsqrt.f32 %v284_v25 }
 0x2b1   :  { %v1031_v27 = vpop.eup %1030 }
 0x2b2   :  { %v288_v29 = vmul.f32 %v1031_v27, %v215_v2 }
 0x2b4   :  { %v296_v32 = vmul.f32 %v566_v28, %v288_v29 }
 0x2b6   :  { %v304_v33 = vadd.f32 %v567_v31, %v296_v32 }
 0x2b8   :  { %v305_v34 = vmax.f32 %v304_v33, 0.0 }
 0x2ba   :  { %811 = vmatmul.mubr.f32.vlgmr.msra.gmra.mrb[2].mxu1 %v305_v34 }
 0x2bb   :  { %1005 = vmatpush3.bf16.msra.mxu1 %v1129_v15  ;;  %880 = vmatprep.mubr.msk.f32.mxu1 %vm1035_vm0, %v1036_v4  ;;  %v568_v4 = vld [vmem:[%s1375_s6] ss:$0 sm:$0xff] }
 0x2bc   :  { %1006 = vmatprep.subr.bf16.mxu1 %v1034_v0 }
 0x2bf   :  { %1008 = vmatpush3.bf16.msra.mxu1 %v1139_v18 }
 0x2c0   :  { %1009 = vmatprep.subr.bf16.mxu1 %v1034_v0 }
 0x2c3   :  { %1011 = vmatpush3.bf16.msra.mxu1 %v1156_v24 }
 0x2c4   :  { %1012 = vmatprep.subr.bf16.mxu1 %v1034_v0 }
 0x2c7   :  { %1014 = vmatpush3.bf16.msra.mxu1 %v1173_v30 }
 0x2c8   :  { %1015 = vmatprep.subr.bf16.mxu1 %v1034_v0 }
 0x2cb   :  { %1017 = vmatpush3.bf16.msra.mxu1 %v1190_v36 }
 0x2cc   :  { %1018 = vmatprep.subr.bf16.mxu1 %v1034_v0 }
 0x2cf   :  { %1020 = vmatpush3.bf16.msra.mxu1 %v1207_v42 }
 0x2d0   :  { %1021 = vmatprep.subr.bf16.mxu1 %v1034_v0 }
 0x2d3   :  { %1023 = vmatpush3.bf16.msra.mxu1 %v1218_v46 }
 0x2d4   :  { %1024 = vmatprep.subr.bf16.mxu1 %v1034_v0 }
 0x2d7   :  { %1026 = vmatpush3.bf16.msra.mxu1 %v1249_v50 }
 0x38d   :  { %v395_v15 = vpop.f32.mrb[2].mxu1 }
 0x38e   :  { %v396_v18 = vadd.f32 %v568_v4, %v395_v15  ;;  %v812_v24 = vpop.f32.mrb[3].mxu1 }
 0x390   :  { %846 = vmatmul.mubr.f32.vlgmr.msra.gmra.mrb[4].mxu0 %v396_v18 }
 0x463   :  { %v465_v30 = vpop.f32.mrb[4].mxu0 }
 0x464   :  { %v469_v35 = vsub.f32 %v396_v18, %v465_v30  ;;  %v847_v36 = vpop.f32.mrb[5].mxu0 }
 0x466   :  { %v470_v37 = vmul.f32 %v469_v35, %v469_v35 }
 0x468   :  { %881 = vmatmul.mubr.f32.vlgmr.msra.gmra.mrb[4].mxu1 %v470_v37 }
 0x53b   :  { %v537_v38 = vpop.f32.mrb[4].mxu1 }
 0x53c   :  { %v538_v39 = vadd.f32 1e-05, %v537_v38  ;;  %v882_v40 = vpop.f32.mrb[5].mxu1 }
 0x53e   :  { %1032 = vrsqrt.f32 %v538_v39 }
 0x548   :  { %v1033_v0 = vpop.eup %1032 }
 0x549   :  { %v542_v42 = vmul.f32 %v1033_v0, %v469_v35 }
 0x54b   :  { %v550_v44 = vmul.f32 %v569_v41, %v542_v42 }
 0x54d   :  { %v558_v45 = vadd.f32 %v570_v43, %v550_v44 }
 0x54f   :  { %v559_v46 = vmax.f32 %v558_v45, 0.0 }
 0x551   :  { %560 = vst [vmem:[%s1378_s10] sm:$0xff] %v559_v46 }

</bundles_post_ra>
